<compile_context>
chip_gen: v6e
topology: v6e:2x2x1
jax: 0.10.0
libtpu: 0.0.40
codegen_flags: <defaults>
</compile_context>

<pallas_src>
import math

import jax
import jax.numpy as jnp
from jax.experimental import pallas as pl
from jax.experimental.pallas import tpu as pltpu


# ----------------------------------------------------------------------------
# Small helpers
# ----------------------------------------------------------------------------
def _round_up(x, m):
    return (x + m - 1) // m * m


def _calc_same_pad(i, k, s, d):
    return max((-(i // -s) - 1) * s + (k - 1) * d + 1 - i, 0)


def _same_pad_arg(input_size, kernel_size, stride, dilation):
    ih, iw = input_size
    kh, kw = kernel_size
    pad_h = _calc_same_pad(ih, kh, stride[0], dilation[0])
    pad_w = _calc_same_pad(iw, kw, stride[1], dilation[1])
    # [left, right, top, bottom] -- nn.ZeroPad2d convention
    return [pad_w // 2, pad_w - pad_w // 2, pad_h // 2, pad_h - pad_h // 2]


# ----------------------------------------------------------------------------
# Deformed-sampling coordinates (torchvision deform_conv2d semantics)
# ----------------------------------------------------------------------------
def _tap_coords(offsets, i, j, kw, Ho, Wo, stride, padding, dilation):
    """Sampling coords (y, x) for kernel tap (i, j), flattened over output px."""
    k = i * kw + j
    base_y = jnp.arange(Ho, dtype=jnp.float32)[:, None] * stride[0] - padding[0]
    base_x = jnp.arange(Wo, dtype=jnp.float32)[None, :] * stride[1] - padding[1]
    y = (base_y + i * dilation[0] + offsets[2 * k]).reshape(-1)
    x = (base_x + j * dilation[1] + offsets[2 * k + 1]).reshape(-1)
    return y, x


def _bilinear_corners(y, x, Hp, Wp):
    """Corner indices / weights / validity exactly as torchvision's kernel."""
    in_range = (y > -1.0) & (y < Hp) & (x > -1.0) & (x < Wp)
    y0 = jnp.floor(y)
    x0 = jnp.floor(x)
    y1, x1 = y0 + 1.0, x0 + 1.0
    ly, lx = y - y0, x - x0
    hy, hx = 1.0 - ly, 1.0 - lx
    corners = []
    for yy, xx, wgt in [(y0, x0, hy * hx), (y0, x1, hy * lx),
                        (y1, x0, ly * hx), (y1, x1, ly * lx)]:
        valid = in_range & (yy >= 0) & (yy <= Hp - 1) & (xx >= 0) & (xx <= Wp - 1)
        yi = jnp.clip(yy, 0, Hp - 1).astype(jnp.int32)
        xi = jnp.clip(xx, 0, Wp - 1).astype(jnp.int32)
        corners.append((yi * Wp + xi, jnp.where(valid, wgt, 0.0)))
    return corners


def build_sampling_matrix(offsets, Hp, Wp, Ho, Wo, kh, kw, stride, padding, dilation):
    """S[k, p_in, q]: bilinear gather matrix for tap k (plain JAX, setup only)."""
    Q = Ho * Wo
    q_idx = jnp.arange(Q)
    taps = []
    for i in range(kh):
        for j in range(kw):
            y, x = _tap_coords(offsets, i, j, kw, Ho, Wo, stride, padding, dilation)
            Sk = jnp.zeros((Hp * Wp, Q), jnp.float32)
            for p_in, w_eff in _bilinear_corners(y, x, Hp, Wp):
                Sk = Sk.at[p_in, q_idx].add(w_eff)
            taps.append(Sk)
    return jnp.stack(taps, axis=0)                     # (K, Hp*Wp, Q)


# ----------------------------------------------------------------------------
# Pallas kernel: one reduction step of  O[M, TQ] += A[M, TK] @ S[TK, TQ]
# ----------------------------------------------------------------------------
def _fused_gemm_kernel(a_ref, s_ref, o_ref):
    @pl.when(pl.program_id(1) == 0)
    def _():
        o_ref[...] = jnp.zeros_like(o_ref)
    # f32 accumulation on the MXU regardless of operand dtype (bf16 fast path).
    o_ref[...] += jnp.dot(a_ref[...], s_ref[...],
                          preferred_element_type=jnp.float32)


def _fused_deform_gemm(a, s, *, tq, tk, vmem_limit_bytes):
    """a: (M_pad, Kc), s: (Kc, Q_pad) -> (M_pad, Q_pad) f32, tiled GEMM."""
    M_pad, Kc = a.shape
    _, Q_pad = s.shape
    nq, nk = Q_pad // tq, Kc // tk
    return pl.pallas_call(
        _fused_gemm_kernel,
        out_shape=jax.ShapeDtypeStruct((M_pad, Q_pad), jnp.float32),
        grid_spec=pltpu.PrefetchScalarGridSpec(
            num_scalar_prefetch=0,
            grid=(nq, nk),                      # reduction (Kc) axis last
            in_specs=[
                pl.BlockSpec((M_pad, tk), lambda q, k: (0, k)),
                pl.BlockSpec((tk, tq), lambda q, k: (k, q)),
            ],
            out_specs=pl.BlockSpec((M_pad, tq), lambda q, k: (0, q)),
        ),
        compiler_params=pltpu.CompilerParams(
            dimension_semantics=("parallel", "arbitrary"),
            vmem_limit_bytes=vmem_limit_bytes),
    )(a, s)


# ----------------------------------------------------------------------------
# Full module forward (SAME padding + fixed spherical offsets + deform conv)
# ----------------------------------------------------------------------------
def deform_conv2d_sphe_same_forward(x, weight, bias, offsets,
                                    stride=(1, 1), padding=(0, 0), dilation=(1, 1),
                                    compute_dtype=jnp.bfloat16,
                                    tq=512, tk=512):
    B, C, H, W = x.shape
    OC, _, kh, kw = weight.shape
    K = kh * kw

    # ZeroPad2d "same" padding (as in the module's forward)
    pw_l, pw_r, ph_t, ph_b = _same_pad_arg((H, W), (kh, kw), stride, dilation)
    x_pad = jnp.pad(x, ((0, 0), (0, 0), (ph_t, ph_b), (pw_l, pw_r)))
    Hp, Wp = x_pad.shape[-2:]

    Ho = (Hp + 2 * padding[0] - kh - (kh - 1) * (dilation[0] - 1)) // stride[0] + 1
    Wo = (Wp + 2 * padding[1] - kw - (kw - 1) * (dilation[1] - 1)) // stride[1] + 1
    assert offsets.shape == (2 * K, Ho, Wo)
    Q = Ho * Wo
    P_in = Hp * Wp

    # Static sampling matrix (depends only on the fixed spherical offsets).
    S = build_sampling_matrix(offsets, Hp, Wp, Ho, Wo, kh, kw,
                              stride, padding, dilation)        # (K, P_in, Q)

    # ---- pad / pack so the whole forward is one lane-dense GEMM ------------
    P_pad = _round_up(P_in, 128)          # unmasked loads / clean MXU K-dim
    Kc_raw = K * P_pad + 1                # +1 contraction row carries the bias
    tk_ = min(tk, _round_up(Kc_raw, 128))
    Kc = _round_up(Kc_raw, tk_)
    tq_ = min(tq, _round_up(Q, 128))
    Q_pad = _round_up(Q, tq_)
    M = B * OC                            # batch folded into the MXU M axis
    M_pad = _round_up(M, 8)

    # Tiny per-tap (OC, C) @ (C, P) products hoisted out of the hot loop.
    x_flat = x_pad.reshape(B, C, P_in)
    x_flat = jnp.pad(x_flat, ((0, 0), (0, 0), (0, P_pad - P_in)))
    w_k = weight.reshape(OC, C, K)                       # tap order k = i*kw + j
    wx = jnp.einsum('ock,bcp->bokp', w_k, x_flat)        # (B, OC, K, P_pad)

    a_full = jnp.zeros((M_pad, Kc), jnp.float32)
    a_full = a_full.at[:M, :K * P_pad].set(wx.reshape(M, K * P_pad))
    a_full = a_full.at[:M, K * P_pad].set(jnp.tile(bias, B))   # bias column

    s_full = jnp.zeros((Kc, Q_pad), jnp.float32)
    s_full = s_full.at[:K * P_pad, :Q].set(
        jnp.pad(S, ((0, 0), (0, P_pad - P_in), (0, 0))).reshape(K * P_pad, Q))
    s_full = s_full.at[K * P_pad, :].set(1.0)                   # bias "ones" row

    a_full = a_full.astype(compute_dtype)
    s_full = s_full.astype(compute_dtype)

    # Explicit VMEM budget: double-buffered A/S tiles + resident f32 out tile.
    itemsize = jnp.dtype(compute_dtype).itemsize
    tile_bytes = 2 * (M_pad * tk_ + tk_ * tq_) * itemsize + 2 * (M_pad * tq_ * 4)
    vmem_limit = min(max(tile_bytes + (8 << 20), 16 << 20), 48 << 20)

    out = _fused_deform_gemm(a_full, s_full, tq=tq_, tk=tk_,
                             vmem_limit_bytes=vmem_limit)
    return out[:M, :Q].reshape(B, OC, Ho, Wo)


# ----------------------------------------------------------------------------
# Pure-JAX reference (direct gather formulation of torchvision deform_conv2d)
# ----------------------------------------------------------------------------
def deform_conv2d_ref(x, weight, bias, offsets, stride, padding, dilation):
    B, C, H, W = x.shape
    OC, _, kh, kw = weight.shape
    pw_l, pw_r, ph_t, ph_b = _same_pad_arg((H, W), (kh, kw), stride, dilation)
    x_pad = jnp.pad(x, ((0, 0), (0, 0), (ph_t, ph_b), (pw_l, pw_r)))
    Hp, Wp = x_pad.shape[-2:]
    Ho, Wo = offsets.shape[-2:]
    Q = Ho * Wo
    x_flat = x_pad.reshape(B, C, Hp * Wp)

    cols = []
    for i in range(kh):
        for j in range(kw):
            y, x_c = _tap_coords(offsets, i, j, kw, Ho, Wo, stride, padding, dilation)
            val = jnp.zeros((B, C, Q), jnp.float32)
            for p_in, w_eff in _bilinear_corners(y, x_c, Hp, Wp):
                val = val + w_eff[None, None, :] * x_flat[:, :, p_in]
            cols.append(val)
    cols = jnp.stack(cols, axis=2)                       # (B, C, K, Q)
    w_mat = weight.reshape(OC, C * kh * kw)
    out = jnp.einsum('om,bmq->boq', w_mat, cols.reshape(B, C * kh * kw, Q))
    out = out + bias[None, :, None]
    return out.reshape(B, OC, Ho, Wo)


# ----------------------------------------------------------------------------
# Main
# ----------------------------------------------------------------------------
if __name__ == "__main__":
    B, C_in, C_out = 2, 4, 8
    H = W = 16
    kh = kw = 3
    stride = (1, 1)
    padding = (0, 0)     # constructor default; SAME pad is applied in forward
    dilation = (1, 1)
    groups = 1

    key = jax.random.PRNGKey(0)
    k_x, k_w, k_b, k_off = jax.random.split(key, 4)

    # Deterministic parameter init (kaiming_uniform_(a=sqrt(5)) style bounds)
    fan_in = (C_in // groups) * kh * kw
    bound = 1.0 / math.sqrt(fan_in)
    weight = jax.random.uniform(k_w, (C_out, C_in // groups, kh, kw),
                                jnp.float32, -bound, bound)
    bias = jax.random.uniform(k_b, (C_out,), jnp.float32, -bound, bound)

    # Input (NCHW, matching the PyTorch module)
    x = jax.random.normal(k_x, (B, C_in, H, W), jnp.float32)

    # Fixed per-module offsets; spatial size = output size of the SAME-padded conv.
    pw_l, pw_r, ph_t, ph_b = _same_pad_arg((H, W), (kh, kw), stride, dilation)
    Hp, Wp = H + ph_t + ph_b, W + pw_l + pw_r
    Ho = (Hp + 2 * padding[0] - kh - (kh - 1) * (dilation[0] - 1)) // stride[0] + 1
    Wo = (Wp + 2 * padding[1] - kw - (kw - 1) * (dilation[1] - 1)) // stride[1] + 1
    # TODO(synk): the original module loads precomputed spherical offsets from
    # ./OFFSETS/*.pt; synthesize deterministic offsets instead (and mimic the
    # module's float16 cast of the offset tensor).
    offsets = jax.random.uniform(k_off, (2 * kh * kw, Ho, Wo),
                                 jnp.float32, -2.0, 2.0)
    offsets = offsets.astype(jnp.float16).astype(jnp.float32)

    ref = jax.block_until_ready(
        deform_conv2d_ref(x, weight, bias, offsets, stride, padding, dilation))

    # fp32 operand path (strict check against the fp32 reference).
    out_f32 = jax.block_until_ready(deform_conv2d_sphe_same_forward(
        x, weight, bias, offsets, stride, padding, dilation,
        compute_dtype=jnp.float32))
    assert out_f32.shape == (B, C_out, H, W), out_f32.shape
    assert jnp.allclose(out_f32, ref, rtol=1e-4, atol=1e-4), (
        float(jnp.max(jnp.abs(out_f32 - ref))))

    # bf16 operand path (default fast path: full-rate MXU, half the S traffic);
    # fp32 accumulation keeps the error well inside bf16 operand tolerance.
    out_bf16 = jax.block_until_ready(deform_conv2d_sphe_same_forward(
        x, weight, bias, offsets, stride, padding, dilation,
        compute_dtype=jnp.bfloat16))
    assert jnp.allclose(out_bf16, ref, rtol=6e-2, atol=6e-2), (
        float(jnp.max(jnp.abs(out_bf16 - ref))))

    print("KERNEL_OK")
</pallas_src>

<mosaic_0001>
module attributes {stable_mosaic.version = 11 : i64} {
  func.func @_fused_gemm_kernel(%arg0: i32, %arg1: i32, %arg2: memref<16x512xf32, #tpu.memory_space<vmem>>, %arg3: memref<512x256xf32, #tpu.memory_space<vmem>>, %arg4: memref<16x256xf32, #tpu.memory_space<vmem>>) attributes {dimension_semantics = [#tpu.dimension_semantics<parallel>, #tpu.dimension_semantics<arbitrary>], iteration_bounds = array<i64: 1, 7>, scalar_prefetch = 0 : i64, scratch_operands = 0 : i64, tpu.core_type = #tpu.core_type<tc>, window_params = [{transform_indices = @transform_0, window_bounds = array<i64: 16, 512>}, {transform_indices = @transform_1, window_bounds = array<i64: 512, 256>}, {transform_indices = @transform_2, window_bounds = array<i64: 16, 256>}]} {
    %c0_i32 = arith.constant 0 : i32
    %0 = arith.cmpi eq, %arg1, %c0_i32 : i32
    %1 = arith.extui %0 : i1 to i32
    %c0_i32_0 = arith.constant 0 : i32
    %2 = arith.cmpi ne, %1, %c0_i32_0 : i32
    scf.if %2 {
      %cst_8 = arith.constant 0.000000e+00 : f32
      %9 = vector.broadcast %cst_8 : f32 to vector<16x256xf32>
      %c0_9 = arith.constant 0 : index
      %c0_10 = arith.constant 0 : index
      %10 = vector.load %arg4[%c0_9, %c0_10] : memref<16x256xf32, #tpu.memory_space<vmem>>, vector<16x256xf32>
      tpu.vector_store %arg4[%c0_9, %c0_10], %9 {strides = array<i32>} : memref<16x256xf32, #tpu.memory_space<vmem>>, vector<16x256xf32>,
    } else {
    }
    %c0 = arith.constant 0 : index
    %c0_1 = arith.constant 0 : index
    %3 = vector.load %arg4[%c0, %c0_1] : memref<16x256xf32, #tpu.memory_space<vmem>>, vector<16x256xf32>
    %c0_2 = arith.constant 0 : index
    %c0_3 = arith.constant 0 : index
    %4 = vector.load %arg2[%c0_2, %c0_3] : memref<16x512xf32, #tpu.memory_space<vmem>>, vector<16x512xf32>
    %c0_4 = arith.constant 0 : index
    %c0_5 = arith.constant 0 : index
    %5 = vector.load %arg3[%c0_4, %c0_5] : memref<512x256xf32, #tpu.memory_space<vmem>>, vector<512x256xf32>
    %cst = arith.constant dense<0.000000e+00> : vector<16x256xf32>
    %6 = tpu.matmul %4, %5, %cst {dimension_numbers = #tpu.dot_dimension_numbers<[1], [0], [0], [1], [0, 0, 1, 1], [], []>} : vector<16x512xf32>, vector<512x256xf32>, vector<16x256xf32> -> vector<16x256xf32>
    %7 = arith.addf %3, %6 : vector<16x256xf32>
    %c0_6 = arith.constant 0 : index
    %c0_7 = arith.constant 0 : index
    %8 = vector.load %arg4[%c0_6, %c0_7] : memref<16x256xf32, #tpu.memory_space<vmem>>, vector<16x256xf32>
    tpu.vector_store %arg4[%c0_6, %c0_7], %7 {strides = array<i32>} : memref<16x256xf32, #tpu.memory_space<vmem>>, vector<16x256xf32>,
    return
  }
  func.func @transform_0(%arg0: i32, %arg1: i32) -> (i32, i32) {
    %c0_i32 = arith.constant 0 : i32
    %c0_i32_0 = arith.constant 0 : i32
    return %c0_i32, %arg1 : i32, i32
  }
  func.func @transform_1(%arg0: i32, %arg1: i32) -> (i32, i32) {
    %c0_i32 = arith.constant 0 : i32
    return %arg1, %arg0 : i32, i32
  }
  func.func @transform_2(%arg0: i32, %arg1: i32) -> (i32, i32) {
    %c0_i32 = arith.constant 0 : i32
    %c0_i32_0 = arith.constant 0 : i32
    return %c0_i32, %arg0 : i32, i32
  }
}

</mosaic_0001>

<bundles_post_ra>
// kernel: tpu_custom_call.1
= control target key start
LH: loop header
LB: loop body
LE: loop exit
PB: predicated region body
PF: predicated region fallthrough
CT: control target
= control target key end

     0   :  { %7 = vsyncpa [#allocation3], 0  ;;  %s1168_s0 = inlined_call_operand.hbm [shape: f32[16,3584], index: 0, kind: input, shape index: {}]   ;;  %s1169_s1 = inlined_call_operand.hbm [shape: f32[3584,256], index: 1, kind: input, shape index: {}]   ;;  %s1170_s2 = inlined_call_operand.hbm [shape: f32[16,256], index: 2, kind: output, shape index: {}]  }
   0x1   :  { %9 = vsyncpa [#allocation3 + $0x1], 0 }
   0x2   :  { %10 = vsyncpa [#allocation6], 0 }
   0x3   :  { %12 = vsyncpa [#allocation6 + $0x1], 0 }
   0x4   :  { %13 = vsyncpa [#allocation4], 0  ;;  %s887_s9 = smov 0   ;;  %s889_s10 = smov 0  }
   0x5   :  { %s891_s11 = smov 0   ;;  %s893_s12 = smov 0  }
   0x6   :  { %s895_s13 = smov 0   ;;  %s897_s14 = smov 0  }
   0x7 LB: > { %s625_s15 = sadd.s32 4294967295, %s859_s14   ;;  %s28_s16 = sadd.s32 1, %s855_s13  ;;  %s859_s14 = sphi %s897_s14, %s19_s14   ;;  %s855_s13 = sphi %s895_s13, %s1180_s13   ;;  %s851_s12 = sphi %s893_s12, %s1179_s12   ;;  %s847_s11 = sphi %s891_s11, %s1178_s11   ;;  %s843_s10 = sphi %s889_s10, %s1177_s10   ;;  %s839_s9 = sphi %s887_s9, %s1176_s9  }
   0x8   : > { %p29_p0 = scmp.ge.s32.totalorder %s28_s16, 7  ;;  %s38_s17 = sadd.s32 1, %s847_s11 }
   0x9   : > { %p45_p1 = scmp.ne.s32.totalorder %s847_s11, %s843_s10  ;;  %p46_p2 = scmp.eq.s32.totalorder %s859_s14, 0 }
   0xa   : > { %s1182_s16 = smov (%p29_p0, %s28_s16), 0  ;;  %p51_p4 = scmp.ne.s32.totalorder %s843_s10, %s839_s9 }
   0xb   : > { %p923_p3 = por %p46_p2, %p45_p1  ;;  %s35_s19 = ssub.s32 %s855_s13, %s1182_s16 }
   0xc   : > { %p52_p5 = scmp.eq.s32.totalorder %s625_s15, 0  ;;  %p36_p6 = scmp.eq.s32.totalorder %s35_s19, 0 }
   0xd   : > { %p661_p8 = scmp.lt.s32.totalorder %s859_s14, 7  ;;  %s941_s22 = sand.u32 1, %s847_s11  }
   0xe   : > { %p932_p7 = por %p52_p5, %p51_p4  ;;  %s643_s23 = sshll.u32 %s855_s13, 9 }
   0xf   : > { %s938_s21 = scalar_select %p36_p6, %s847_s11, %s38_s17  }
  0x10   : > { %s628_s24 = sshll.u32 %s941_s22, 6  ;;  %s139_s27 = scalar_lea.hbm %s1168_s0, %s643_s23 }
  0x11   : > { %s133_s28 = scalar_lea.vmem [#allocation2], %s628_s24  ;;  %p950_p9 = pnand %p661_p8, %p923_p3 }
  0x12   : > { %s140_s29 = sshll.u32 %s133_s28, 4  ;;  %p635_p10 = scmp.ge.s32.totalorder %s859_s14, 1  ;;  %s141_s29 = int_to_ptr.vmem [resolvable:$true] %s140_s29 }
  0x13   : > { %s130_s3 = scalar_lea.sflag [#allocation3], %s941_s22  ;;  %p723_p11 = pneg %p950_p9 }
  0x14   : > { %s734_s4 = scalar_lea.vmem %s141_s29, 1024  ;;  %s861_s5 = smov [#allocation2]  }
  0x15   : > { %p735_p12 = scmp.ne.s32.totalorder %s141_s29, %s734_s4  ;;  %s739_s6 = sshll.u32 %s861_s5, 4  ;;  %s740_s6 = int_to_ptr.vmem [resolvable:$false] %s739_s6 }
  0x16   : > { %s741_s7 = scalar_lea.vmem %s740_s6, 2048  ;;  %p742_p1 = scmp.lt.s32.totalorder %s141_s29, %s740_s6 }
  0x17   : > { %p737_p13 = pnand %p735_p12, %p723_p11  ;;  %p743_p2 = scmp.lt.s32.totalorder %s741_s7, %s734_s4 }
  0x19   : > { %p738_p0 = pneg %p737_p13  ;;  %p744_p3 = por %p743_p2, %p742_p1 }
  0x1b   : > { %p745_p4 = pnand %p744_p3, %p738_p0 }
  0x1d   : > { %748 = shalt.err (!%p745_p4)
}
  0x1e   : > { %s862_s8 = smov 3584   ;;  %s863_s9 = smov 512  }
  0x1f   : > { %s864_s17 = smov 32   ;;  %p172_p5 = scmp.lt.s32.totalorder %s859_s14, 8 }
  0x20   : > { %657 = dma.hbm_to_vmem [thread:$0]  (!%p950_p9), %s139_s27, 1024, %s141_s29, %s130_s3, %s862_s8, %s863_s9, %s864_s17  }
  0x21   : > { %s631_s18 = sshll.u32 %s941_s22, 10  ;;  %s645_s19 = sshll.u32 %s855_s13, 14 }
  0x22   : > { %p968_p6 = pnand %p635_p10, %p172_p5  ;;  %s163_s26 = scalar_lea.hbm %s1169_s1, %s645_s19 }
  0x23   : > { %s154_s28 = scalar_lea.vmem [#allocation5], %s631_s18  ;;  %s151_s5 = scalar_lea.sflag [#allocation6], %s941_s22 }
  0x24   : > { %s164_s4 = sshll.u32 %s154_s28, 4  ;;  %s865_s27 = smov [#allocation5]   ;;  %s165_s4 = int_to_ptr.vmem [resolvable:$true] %s164_s4 }
  0x25   : > { %s762_s6 = scalar_lea.vmem %s165_s4, 16384  ;;  %s767_s29 = sshll.u32 %s865_s27, 4  ;;  %s768_s29 = int_to_ptr.vmem [resolvable:$false] %s767_s29 }
  0x26   : > { %p763_p8 = scmp.ne.s32.totalorder %s165_s4, %s762_s6  ;;  %s769_s3 = scalar_lea.vmem %s768_s29, 32768 }
  0x27   : > { %p770_p10 = scmp.lt.s32.totalorder %s165_s4, %s768_s29  ;;  %p771_p0 = scmp.lt.s32.totalorder %s769_s3, %s762_s6 }
  0x28   : > { %p765_p12 = pnand %p763_p8, %p723_p11 }
  0x29   : > { %p772_p1 = por %p771_p0, %p770_p10 }
  0x2a   : > { %p766_p13 = pneg %p765_p12 }
  0x2c   : > { %p773_p2 = pnand %p772_p1, %p766_p13 }
  0x2e   : > { %776 = shalt.err (!%p773_p2)
}
  0x2f   : > { %s866_s7 = smov 256   ;;  %s867_s8 = smov 16  }
  0x30   : > { %660 = dma.hbm_to_vmem [thread:$0]  (!%p950_p9), %s163_s26, 16384, %s165_s4, %s151_s5, %s866_s7, %s866_s7, %s867_s8  }
  0x31   : > { %176 = sbr.rel (%p968_p6) target bundleno = 344 (0x158), region = 28  ;;  %s178_s22 = sand.u32 (!%p968_p6), 1, %s843_s10  }
  0x32   : > { %s636_s9 = sshll.u32 (!%p968_p6), %s178_s22, 6  ;;  %s179_s17 = scalar_lea.sflag (!%p968_p6), [#allocation3], %s178_s22 }
  0x33   : > { %s984_s18 = scalar_lea.vmem (!%p968_p6), [#allocation2], %s636_s9 }
  0x36   : > { %826 = dma.done.wait (%p932_p7), %s179_s17, 1024  }
  0x37   : > { %828 = vsyncadd (%p932_p7), %s179_s17, 4294966272  ;;  %s637_s19 = sshll.u32 %s178_s22, 10  ;;  %s188_s24 = scalar_lea.sflag [#allocation6], %s178_s22 }
  0x38   : > { %s990_s30 = scalar_lea.vmem [#allocation5], %s637_s19 }
  0x39   : > { %830 = dma.done.wait (%p932_p7), %s188_s24, 16384  }
  0x3a   : > { %832 = vsyncadd (%p932_p7), %s188_s24, 4294950912  ;;  %p638_p9 = scmp.ne.s32.totalorder %s851_s12, 0 }
  0x3c   : > { %219 = sbr.rel (%p638_p9) target bundleno = 68 (0x44), region = 40 }
  0x41   : > { %v868_v0 = vmov 0.0  }
  0x42   : > { %220 = vst [vmem:[#allocation7] sm:$0xff] %v868_v0  ;;  %221 = vst [vmem:[#allocation7 + $0x8] sm:$0xff] %v868_v0 }
  0x43   : > { %222 = vst [vmem:[#allocation7 + $0x10] sm:$0xff] %v868_v0  ;;  %223 = vst [vmem:[#allocation7 + $0x18] sm:$0xff] %v868_v0 }
  0x44 PF: > { %v267_v1 = vld [vmem:[%s990_s30 + $0xf8] sm:$0xff]  ;;  %v266_v3 = vld [vmem:[%s990_s30 + $0xf0] sm:$0xff]  ;;  %v265_v5 = vld [vmem:[%s990_s30 + $0xe8] sm:$0xff]  ;;  %s869_s12 = smov [#allocation7]   ;;  %p1135_p7 = scmp.eq.s32.totalorder %s625_s15, 6 }
  0x45   : > { %v331_v2 = vld [vmem:[%s990_s30 + $0x2f8] sm:$0xff]  ;;  %364 = vmatprep.subr.mxu0 %v267_v1  ;;  %v330_v4 = vld [vmem:[%s990_s30 + $0x2f0] sm:$0xff]  ;;  %v329_v6 = vld [vmem:[%s990_s30 + $0x2e8] sm:$0xff]  ;;  %s535_s20 = sshll.u32 %s869_s12, 4  ;;  %s536_s20 = int_to_ptr.vmem [resolvable:$true] %s535_s20 }
  0x46   : > { %441 = vmatprep.subr.mxu1 %v331_v2  ;;  %365 = vmatpush1.msra.mxu0 %v266_v3  ;;  %v264_v7 = vld [vmem:[%s990_s30 + $0xe0] sm:$0xff]  ;;  %v263_v9 = vld [vmem:[%s990_s30 + $0xd8] sm:$0xff]  ;;  %v262_v11 = vld [vmem:[%s990_s30 + $0xd0] sm:$0xff]  ;;  %s777_s25 = scalar_lea.vmem %s536_s20, 512  ;;  %p784_p5 = scmp.lt.s32.totalorder %s536_s20, %s536_s20 }
  0x47   : > { %442 = vmatpush1.msra.mxu1 %v330_v4  ;;  %v328_v8 = vld [vmem:[%s990_s30 + $0x2e0] sm:$0xff]  ;;  %366 = vmatprep.subr.mxu0 %v265_v5  ;;  %v327_v10 = vld [vmem:[%s990_s30 + $0x2d8] sm:$0xff]  ;;  %v326_v12 = vld [vmem:[%s990_s30 + $0x2d0] sm:$0xff]  ;;  %p778_p11 = scmp.ne.s32.totalorder %s536_s20, %s777_s25  ;;  %p785_p6 = scmp.lt.s32.totalorder %s777_s25, %s777_s25 }
  0x48   : > { %443 = vmatprep.subr.mxu1 %v329_v6  ;;  %367 = vmatpush1.msra.mxu0 %v264_v7  ;;  %v261_v13 = vld [vmem:[%s990_s30 + $0xc8] sm:$0xff]  ;;  %v260_v15 = vld [vmem:[%s990_s30 + $0xc0] sm:$0xff]  ;;  %v259_v17 = vld [vmem:[%s990_s30 + $0xb8] sm:$0xff] }
  0x49   : > { %444 = vmatpush1.msra.mxu1 %v328_v8  ;;  %v325_v14 = vld [vmem:[%s990_s30 + $0x2c8] sm:$0xff]  ;;  %368 = vmatprep.subr.mxu0 %v263_v9  ;;  %v324_v16 = vld [vmem:[%s990_s30 + $0x2c0] sm:$0xff]  ;;  %v323_v18 = vld [vmem:[%s990_s30 + $0x2b8] sm:$0xff]  ;;  %p779_p3 = pnand %p778_p11, %p1135_p7  ;;  %p786_p8 = por %p785_p6, %p784_p5 }
  0x4a   : > { %445 = vmatprep.subr.mxu1 %v327_v10  ;;  %369 = vmatpush1.msra.mxu0 %v262_v11  ;;  %v258_v19 = vld [vmem:[%s990_s30 + $0xb0] sm:$0xff]  ;;  %v257_v21 = vld [vmem:[%s990_s30 + $0xa8] sm:$0xff]  ;;  %v256_v23 = vld [vmem:[%s990_s30 + $0xa0] sm:$0xff] }
  0x4b   : > { %446 = vmatpush1.msra.mxu1 %v326_v12  ;;  %370 = vmatprep.subr.mxu0 %v261_v13  ;;  %v322_v20 = vld [vmem:[%s990_s30 + $0x2b0] sm:$0xff]  ;;  %v321_v22 = vld [vmem:[%s990_s30 + $0x2a8] sm:$0xff]  ;;  %v320_v24 = vld [vmem:[%s990_s30 + $0x2a0] sm:$0xff]  ;;  %p780_p4 = pneg %p779_p3 }
  0x4c   : > { %447 = vmatprep.subr.mxu1 %v325_v14  ;;  %371 = vmatpush1.msra.mxu0 %v260_v15  ;;  %v255_v25 = vld [vmem:[%s990_s30 + $0x98] sm:$0xff]  ;;  %v254_v27 = vld [vmem:[%s990_s30 + $0x90] sm:$0xff]  ;;  %v253_v29 = vld [vmem:[%s990_s30 + $0x88] sm:$0xff] }
  0x4d   : > { %448 = vmatpush1.msra.mxu1 %v324_v16  ;;  %372 = vmatprep.subr.mxu0 %v259_v17  ;;  %v319_v26 = vld [vmem:[%s990_s30 + $0x298] sm:$0xff]  ;;  %v318_v28 = vld [vmem:[%s990_s30 + $0x290] sm:$0xff]  ;;  %v317_v30 = vld [vmem:[%s990_s30 + $0x288] sm:$0xff]  ;;  %p787_p12 = pnand %p786_p8, %p780_p4 }
  0x4e   : > { %449 = vmatprep.subr.mxu1 %v323_v18  ;;  %373 = vmatpush1.msra.mxu0 %v258_v19  ;;  %v252_v31 = vld [vmem:[%s990_s30 + $0x80] sm:$0xff]  ;;  %v251_v33 = vld [vmem:[%s990_s30 + $0x78] sm:$0xff]  ;;  %v250_v35 = vld [vmem:[%s990_s30 + $0x70] sm:$0xff] }
  0x4f   : > { %450 = vmatpush1.msra.mxu1 %v322_v20  ;;  %374 = vmatprep.subr.mxu0 %v257_v21  ;;  %v316_v32 = vld [vmem:[%s990_s30 + $0x280] sm:$0xff]  ;;  %v315_v34 = vld [vmem:[%s990_s30 + $0x278] sm:$0xff]  ;;  %v314_v36 = vld [vmem:[%s990_s30 + $0x270] sm:$0xff] }
  0x50   : > { %451 = vmatprep.subr.mxu1 %v321_v22  ;;  %375 = vmatpush1.msra.mxu0 %v256_v23  ;;  %v249_v37 = vld [vmem:[%s990_s30 + $0x68] sm:$0xff]  ;;  %v248_v39 = vld [vmem:[%s990_s30 + $0x60] sm:$0xff]  ;;  %v247_v41 = vld [vmem:[%s990_s30 + $0x58] sm:$0xff] }
  0x51   : > { %452 = vmatpush1.msra.mxu1 %v320_v24  ;;  %376 = vmatprep.subr.mxu0 %v255_v25  ;;  %v313_v38 = vld [vmem:[%s990_s30 + $0x268] sm:$0xff]  ;;  %v312_v40 = vld [vmem:[%s990_s30 + $0x260] sm:$0xff]  ;;  %v311_v42 = vld [vmem:[%s990_s30 + $0x258] sm:$0xff] }
  0x52   : > { %453 = vmatprep.subr.mxu1 %v319_v26  ;;  %377 = vmatpush1.msra.mxu0 %v254_v27  ;;  %v246_v43 = vld [vmem:[%s990_s30 + $0x50] sm:$0xff]  ;;  %v245_v45 = vld [vmem:[%s990_s30 + $0x48] sm:$0xff]  ;;  %v244_v47 = vld [vmem:[%s990_s30 + $0x40] sm:$0xff] }
  0x53   : > { %454 = vmatpush1.msra.mxu1 %v318_v28  ;;  %378 = vmatprep.subr.mxu0 %v253_v29  ;;  %v310_v44 = vld [vmem:[%s990_s30 + $0x250] sm:$0xff]  ;;  %v309_v46 = vld [vmem:[%s990_s30 + $0x248] sm:$0xff]  ;;  %v308_v48 = vld [vmem:[%s990_s30 + $0x240] sm:$0xff] }
  0x54   : > { %455 = vmatprep.subr.mxu1 %v317_v30  ;;  %379 = vmatpush1.msra.mxu0 %v252_v31  ;;  %v243_v49 = vld [vmem:[%s990_s30 + $0x38] sm:$0xff]  ;;  %v242_v51 = vld [vmem:[%s990_s30 + $0x30] sm:$0xff]  ;;  %v241_v53 = vld [vmem:[%s990_s30 + $0x28] sm:$0xff] }
  0x55   : > { %456 = vmatpush1.msra.mxu1 %v316_v32  ;;  %380 = vmatprep.subr.mxu0 %v251_v33  ;;  %v307_v50 = vld [vmem:[%s990_s30 + $0x238] sm:$0xff]  ;;  %v306_v52 = vld [vmem:[%s990_s30 + $0x230] sm:$0xff]  ;;  %v305_v54 = vld [vmem:[%s990_s30 + $0x228] sm:$0xff] }
  0x56   : > { %457 = vmatprep.subr.mxu1 %v315_v34  ;;  %381 = vmatpush1.msra.mxu0 %v250_v35  ;;  %v240_v55 = vld [vmem:[%s990_s30 + $0x20] sm:$0xff]  ;;  %v239_v57 = vld [vmem:[%s990_s30 + $0x18] sm:$0xff]  ;;  %v238_v59 = vld [vmem:[%s990_s30 + $0x10] sm:$0xff] }
  0x57   : > { %458 = vmatpush1.msra.mxu1 %v314_v36  ;;  %382 = vmatprep.subr.mxu0 %v249_v37  ;;  %v304_v56 = vld [vmem:[%s990_s30 + $0x220] sm:$0xff]  ;;  %v303_v58 = vld [vmem:[%s990_s30 + $0x218] sm:$0xff]  ;;  %v302_v60 = vld [vmem:[%s990_s30 + $0x210] sm:$0xff] }
  0x58   : > { %459 = vmatprep.subr.mxu1 %v313_v38  ;;  %383 = vmatpush1.msra.mxu0 %v248_v39  ;;  %v237_v61 = vld [vmem:[%s990_s30 + $0x8] sm:$0xff]  ;;  %v236_v63 = vld [vmem:[%s990_s30] sm:$0xff]  ;;  %v299_v1 = vld [vmem:[%s990_s30 + $0x1f8] sm:$0xff] }
  0x59   : > { %460 = vmatpush1.msra.mxu1 %v312_v40  ;;  %384 = vmatprep.subr.mxu0 %v247_v41  ;;  %v301_v62 = vld [vmem:[%s990_s30 + $0x208] sm:$0xff]  ;;  %v300_v0 = vld [vmem:[%s990_s30 + $0x200] sm:$0xff]  ;;  %v363_v2 = vld [vmem:[%s990_s30 + $0x3f8] sm:$0xff] }
  0x5a   : > { %461 = vmatprep.subr.mxu1 %v311_v42  ;;  %385 = vmatpush1.msra.mxu0 %v246_v43  ;;  %v298_v3 = vld [vmem:[%s990_s30 + $0x1f0] sm:$0xff]  ;;  %v297_v5 = vld [vmem:[%s990_s30 + $0x1e8] sm:$0xff]  ;;  %v296_v7 = vld [vmem:[%s990_s30 + $0x1e0] sm:$0xff] }
  0x5b   : > { %462 = vmatpush1.msra.mxu1 %v310_v44  ;;  %386 = vmatprep.subr.mxu0 %v245_v45  ;;  %v362_v4 = vld [vmem:[%s990_s30 + $0x3f0] sm:$0xff]  ;;  %v361_v6 = vld [vmem:[%s990_s30 + $0x3e8] sm:$0xff]  ;;  %v360_v8 = vld [vmem:[%s990_s30 + $0x3e0] sm:$0xff] }
  0x5c   : > { %463 = vmatprep.subr.mxu1 %v309_v46  ;;  %387 = vmatpush1.msra.mxu0 %v244_v47  ;;  %v295_v9 = vld [vmem:[%s990_s30 + $0x1d8] sm:$0xff]  ;;  %v294_v11 = vld [vmem:[%s990_s30 + $0x1d0] sm:$0xff]  ;;  %v293_v13 = vld [vmem:[%s990_s30 + $0x1c8] sm:$0xff] }
  0x5d   : > { %464 = vmatpush1.msra.mxu1 %v308_v48  ;;  %388 = vmatprep.subr.mxu0 %v243_v49  ;;  %v359_v10 = vld [vmem:[%s990_s30 + $0x3d8] sm:$0xff]  ;;  %v358_v12 = vld [vmem:[%s990_s30 + $0x3d0] sm:$0xff]  ;;  %v357_v14 = vld [vmem:[%s990_s30 + $0x3c8] sm:$0xff] }
  0x5e   : > { %465 = vmatprep.subr.mxu1 %v307_v50  ;;  %389 = vmatpush1.msra.mxu0 %v242_v51  ;;  %v292_v15 = vld [vmem:[%s990_s30 + $0x1c0] sm:$0xff]  ;;  %v291_v17 = vld [vmem:[%s990_s30 + $0x1b8] sm:$0xff]  ;;  %v290_v19 = vld [vmem:[%s990_s30 + $0x1b0] sm:$0xff] }
  0x5f   : > { %466 = vmatpush1.msra.mxu1 %v306_v52  ;;  %390 = vmatprep.subr.mxu0 %v241_v53  ;;  %v356_v16 = vld [vmem:[%s990_s30 + $0x3c0] sm:$0xff]  ;;  %v355_v18 = vld [vmem:[%s990_s30 + $0x3b8] sm:$0xff]  ;;  %v354_v20 = vld [vmem:[%s990_s30 + $0x3b0] sm:$0xff] }
  0x60   : > { %467 = vmatprep.subr.mxu1 %v305_v54  ;;  %391 = vmatpush1.msra.mxu0 %v240_v55  ;;  %v289_v21 = vld [vmem:[%s990_s30 + $0x1a8] sm:$0xff]  ;;  %v288_v23 = vld [vmem:[%s990_s30 + $0x1a0] sm:$0xff]  ;;  %v287_v25 = vld [vmem:[%s990_s30 + $0x198] sm:$0xff] }
  0x61   : > { %468 = vmatpush1.msra.mxu1 %v304_v56  ;;  %392 = vmatprep.subr.mxu0 %v239_v57  ;;  %v353_v22 = vld [vmem:[%s990_s30 + $0x3a8] sm:$0xff]  ;;  %v352_v24 = vld [vmem:[%s990_s30 + $0x3a0] sm:$0xff]  ;;  %v351_v26 = vld [vmem:[%s990_s30 + $0x398] sm:$0xff] }
  0x62   : > { %469 = vmatprep.subr.mxu1 %v303_v58  ;;  %393 = vmatpush1.msra.mxu0 %v238_v59  ;;  %v286_v27 = vld [vmem:[%s990_s30 + $0x190] sm:$0xff]  ;;  %v285_v29 = vld [vmem:[%s990_s30 + $0x188] sm:$0xff]  ;;  %v284_v31 = vld [vmem:[%s990_s30 + $0x180] sm:$0xff] }
  0x63   : > { %470 = vmatpush1.msra.mxu1 %v302_v60  ;;  %394 = vmatprep.subr.mxu0 %v237_v61  ;;  %v350_v28 = vld [vmem:[%s990_s30 + $0x390] sm:$0xff]  ;;  %v349_v30 = vld [vmem:[%s990_s30 + $0x388] sm:$0xff]  ;;  %v348_v32 = vld [vmem:[%s990_s30 + $0x380] sm:$0xff] }
  0x64   : > { %471 = vmatprep.subr.mxu1 %v301_v62  ;;  %395 = vmatpush1.msra.mxu0 %v236_v63  ;;  %v283_v33 = vld [vmem:[%s990_s30 + $0x178] sm:$0xff]  ;;  %v282_v35 = vld [vmem:[%s990_s30 + $0x170] sm:$0xff]  ;;  %v281_v37 = vld [vmem:[%s990_s30 + $0x168] sm:$0xff] }
  0x65   : > { %472 = vmatpush1.msra.mxu1 %v300_v0  ;;  %396 = vmatprep.subr.mxu0 %v299_v1  ;;  %v347_v34 = vld [vmem:[%s990_s30 + $0x378] sm:$0xff]  ;;  %v346_v36 = vld [vmem:[%s990_s30 + $0x370] sm:$0xff]  ;;  %v345_v38 = vld [vmem:[%s990_s30 + $0x368] sm:$0xff] }
  0x66   : > { %473 = vmatprep.subr.mxu1 %v363_v2  ;;  %397 = vmatpush2.msra.mxu0 %v298_v3  ;;  %v280_v39 = vld [vmem:[%s990_s30 + $0x160] sm:$0xff]  ;;  %v279_v41 = vld [vmem:[%s990_s30 + $0x158] sm:$0xff]  ;;  %v278_v43 = vld [vmem:[%s990_s30 + $0x150] sm:$0xff] }
  0x67   : > { %474 = vmatpush2.msra.mxu1 %v362_v4  ;;  %398 = vmatprep.subr.mxu0 %v297_v5  ;;  %v344_v40 = vld [vmem:[%s990_s30 + $0x360] sm:$0xff]  ;;  %v343_v42 = vld [vmem:[%s990_s30 + $0x358] sm:$0xff]  ;;  %v342_v44 = vld [vmem:[%s990_s30 + $0x350] sm:$0xff] }
  0x68   : > { %475 = vmatprep.subr.mxu1 %v361_v6  ;;  %399 = vmatpush2.msra.mxu0 %v296_v7  ;;  %v277_v45 = vld [vmem:[%s990_s30 + $0x148] sm:$0xff]  ;;  %v276_v47 = vld [vmem:[%s990_s30 + $0x140] sm:$0xff]  ;;  %v275_v49 = vld [vmem:[%s990_s30 + $0x138] sm:$0xff] }
  0x69   : > { %476 = vmatpush2.msra.mxu1 %v360_v8  ;;  %400 = vmatprep.subr.mxu0 %v295_v9  ;;  %v341_v46 = vld [vmem:[%s990_s30 + $0x348] sm:$0xff]  ;;  %v340_v48 = vld [vmem:[%s990_s30 + $0x340] sm:$0xff]  ;;  %v339_v50 = vld [vmem:[%s990_s30 + $0x338] sm:$0xff] }
  0x6a   : > { %477 = vmatprep.subr.mxu1 %v359_v10  ;;  %401 = vmatpush2.msra.mxu0 %v294_v11  ;;  %v274_v51 = vld [vmem:[%s990_s30 + $0x130] sm:$0xff]  ;;  %v273_v53 = vld [vmem:[%s990_s30 + $0x128] sm:$0xff]  ;;  %v272_v55 = vld [vmem:[%s990_s30 + $0x120] sm:$0xff] }
  0x6b   : > { %478 = vmatpush2.msra.mxu1 %v358_v12  ;;  %402 = vmatprep.subr.mxu0 %v293_v13  ;;  %v338_v52 = vld [vmem:[%s990_s30 + $0x330] sm:$0xff]  ;;  %v337_v54 = vld [vmem:[%s990_s30 + $0x328] sm:$0xff]  ;;  %v336_v56 = vld [vmem:[%s990_s30 + $0x320] sm:$0xff] }
  0x6c   : > { %479 = vmatprep.subr.mxu1 %v357_v14  ;;  %403 = vmatpush2.msra.mxu0 %v292_v15  ;;  %v271_v57 = vld [vmem:[%s990_s30 + $0x118] sm:$0xff]  ;;  %v270_v59 = vld [vmem:[%s990_s30 + $0x110] sm:$0xff]  ;;  %v269_v61 = vld [vmem:[%s990_s30 + $0x108] sm:$0xff] }
  0x6d   : > { %480 = vmatpush2.msra.mxu1 %v356_v16  ;;  %404 = vmatprep.subr.mxu0 %v291_v17  ;;  %v335_v58 = vld [vmem:[%s990_s30 + $0x318] sm:$0xff]  ;;  %v334_v60 = vld [vmem:[%s990_s30 + $0x310] sm:$0xff]  ;;  %v333_v62 = vld [vmem:[%s990_s30 + $0x308] sm:$0xff] }
  0x6e   : > { %481 = vmatprep.subr.mxu1 %v355_v18  ;;  %405 = vmatpush2.msra.mxu0 %v290_v19  ;;  %v268_v63 = vld [vmem:[%s990_s30 + $0x100] sm:$0xff]  ;;  %v229_v0 = vld [vmem:[%s984_s18 + $0x8] sm:$0xff]  ;;  %v231_v2 = vld [vmem:[%s984_s18 + $0x18] sm:$0xff] }
  0x6f   : > { %482 = vmatpush2.msra.mxu1 %v354_v20  ;;  %406 = vmatprep.subr.mxu0 %v289_v21  ;;  %v332_v1 = vld [vmem:[%s990_s30 + $0x300] sm:$0xff]  ;;  %v230_v4 = vld [vmem:[%s984_s18 + $0x10] sm:$0xff]  ;;  %v233_v5 = vld [vmem:[%s984_s18 + $0x28] sm:$0xff] }
  0x70   : > { %483 = vmatprep.subr.mxu1 %v353_v22  ;;  %407 = vmatpush2.msra.mxu0 %v288_v23  ;;  %v228_v3 = vld [vmem:[%s984_s18] sm:$0xff]  ;;  %v235_v6 = vld [vmem:[%s984_s18 + $0x38] sm:$0xff]  ;;  %v234_v8 = vld [vmem:[%s984_s18 + $0x30] sm:$0xff] }
  0x71   : > { %484 = vmatpush2.msra.mxu1 %v352_v24  ;;  %408 = vmatprep.subr.mxu0 %v287_v25  ;;  %v232_v7 = vld [vmem:[%s984_s18 + $0x20] sm:$0xff]  ;;  %v225_v14 = vld [vmem:[#allocation7 + $0x8] sm:$0xff]  ;;  %v226_v19 = vld [vmem:[#allocation7 + $0x10] sm:$0xff] }
  0x72   : > { %485 = vmatprep.subr.mxu1 %v351_v26  ;;  %409 = vmatpush2.msra.mxu0 %v286_v27  ;;  %v224_v10 = vld [vmem:[#allocation7] sm:$0xff]  ;;  %v227_v24 = vld [vmem:[#allocation7 + $0x18] sm:$0xff] }
  0x73   : > { %486 = vmatpush2.msra.mxu1 %v350_v28  ;;  %410 = vmatprep.subr.mxu0 %v285_v29 }
  0x74   : > { %487 = vmatprep.subr.mxu1 %v349_v30  ;;  %411 = vmatpush2.msra.mxu0 %v284_v31 }
  0x75   : > { %488 = vmatpush2.msra.mxu1 %v348_v32  ;;  %412 = vmatprep.subr.mxu0 %v283_v33 }
  0x76   : > { %489 = vmatprep.subr.mxu1 %v347_v34  ;;  %413 = vmatpush2.msra.mxu0 %v282_v35 }
  0x77   : > { %490 = vmatpush2.msra.mxu1 %v346_v36  ;;  %414 = vmatprep.subr.mxu0 %v281_v37 }
  0x78   : > { %491 = vmatprep.subr.mxu1 %v345_v38  ;;  %415 = vmatpush2.msra.mxu0 %v280_v39 }
  0x79   : > { %492 = vmatpush2.msra.mxu1 %v344_v40  ;;  %416 = vmatprep.subr.mxu0 %v279_v41 }
  0x7a   : > { %493 = vmatprep.subr.mxu1 %v343_v42  ;;  %417 = vmatpush2.msra.mxu0 %v278_v43 }
  0x7b   : > { %494 = vmatpush2.msra.mxu1 %v342_v44  ;;  %418 = vmatprep.subr.mxu0 %v277_v45 }
  0x7c   : > { %495 = vmatprep.subr.mxu1 %v341_v46  ;;  %419 = vmatpush2.msra.mxu0 %v276_v47 }
  0x7d   : > { %496 = vmatpush2.msra.mxu1 %v340_v48  ;;  %420 = vmatprep.subr.mxu0 %v275_v49 }
  0x7e   : > { %497 = vmatprep.subr.mxu1 %v339_v50  ;;  %421 = vmatpush2.msra.mxu0 %v274_v51 }
  0x7f   : > { %498 = vmatpush2.msra.mxu1 %v338_v52  ;;  %422 = vmatprep.subr.mxu0 %v273_v53 }
  0x80   : > { %499 = vmatprep.subr.mxu1 %v337_v54  ;;  %423 = vmatpush2.msra.mxu0 %v272_v55 }
  0x81   : > { %500 = vmatpush2.msra.mxu1 %v336_v56  ;;  %424 = vmatprep.subr.mxu0 %v271_v57 }
  0x82   : > { %501 = vmatprep.subr.mxu1 %v335_v58  ;;  %425 = vmatpush2.msra.mxu0 %v270_v59 }
  0x83   : > { %502 = vmatpush2.msra.mxu1 %v334_v60  ;;  %426 = vmatprep.subr.mxu0 %v269_v61 }
  0x84   : > { %503 = vmatprep.subr.mxu1 %v333_v62  ;;  %427 = vmatpush2.msra.mxu0 %v268_v63 }
  0x85   : > { %428 = vmatprep.mubr.f32.mxu0 %v229_v0  ;;  %504 = vmatpush2.msra.mxu1 %v332_v1 }
  0x86   : > { %505 = vmatprep.mubr.f32.mxu1 %v231_v2  ;;  %429 = vmatmul.mubr.f32.vlgmr.msra.gmra.mxu0 %v228_v3 }
  0x87   : > { %506 = vmatmul.mubr.f32.vlgmr.msra.gmra.mxu1 %v230_v4  ;;  %434 = vmatprep.mubr.f32.mxu0 %v233_v5 }
  0x88   : > { %511 = vmatprep.mubr.f32.mxu1 %v235_v6 }
  0x8a   : > { %435 = vmatmul.mubr.f32.gmra.mxu0 %v232_v7 }
  0x8b   : > { %512 = vmatmul.mubr.f32.gmra.mxu1 %v234_v8 }
 0x146   : > { %v430_v9 = vpop.f32.mrf.mxu0 }
 0x147   : > { %v507_v11 = vpop.f32.mrf.mxu1 }
 0x148   : > { %v508_v12 = vadd.f32 %v507_v11, %v430_v9  ;;  %v432_v13 = vpop.f32.mrf.mxu0 }
 0x149   : > { %v509_v15 = vpop.f32.mrf.mxu1 }
 0x14a   : > { %v518_v16 = vadd.f32 %v508_v12, %v224_v10  ;;  %v510_v17 = vadd.f32 %v509_v15, %v432_v13  ;;  %v436_v18 = vpop.f32.mrf.mxu0 }
 0x14b   : > { %v513_v20 = vpop.f32.mrf.mxu1 }
 0x14c   : > { %522 = vst [vmem:[#allocation7] sm:$0xff] %v518_v16  ;;  %v519_v21 = vadd.f32 %v510_v17, %v225_v14  ;;  %v514_v22 = vadd.f32 %v513_v20, %v436_v18  ;;  %v438_v23 = vpop.f32.mrf.mxu0 }
 0x14d   : > { %v515_v25 = vpop.f32.mrf.mxu1 }
 0x14e   : > { %523 = vst [vmem:[#allocation7 + $0x8] sm:$0xff] %v519_v21  ;;  %v520_v26 = vadd.f32 %v514_v22, %v226_v19  ;;  %v516_v27 = vadd.f32 %v515_v25, %v438_v23 }
 0x150   : > { %524 = vst [vmem:[#allocation7 + $0x10] sm:$0xff] %v520_v26  ;;  %v521_v28 = vadd.f32 %v516_v27, %v227_v24 }
 0x152   : > { %525 = vst [vmem:[#allocation7 + $0x18] sm:$0xff] %v521_v28 }
 0x153   : > { %790 = shalt.err (!%p787_p12)
}
 0x154   : > { %s870_s26 = smov 256   ;;  %s871_s15 = smov 16  }
 0x155   : > { %651 = dma.vmem_to_hbm [thread:$0]  (%p1135_p7), %s536_s20, 512, %s1170_s2, [#allocation4], %s870_s26, %s870_s26, %s871_s15  }
 0x156   : > { %834 = dma.done.wait (%p1135_p7), [#allocation4], 512  }
 0x157   : > { %836 = vsyncadd (%p1135_p7), [#allocation4], 4294966784 }
 0x158 PF: > { %s19_s14 = sadd.s32 1, %s859_s14   ;;  %s1176_s9 = smov %s843_s10 }
 0x159   : > { %p16_p13 = scmp.ge.s32.totalorder %s19_s14, 9   ;;  %s1177_s10 = smov %s847_s11 }
 0x15a   : > { %s1178_s11 = smov %s938_s21  ;;  %s1179_s12 = smov %s855_s13 }
 0x15b   : > { %s1180_s13 = smov %s1182_s16  ;;  %18 = sbr.rel (!%p16_p13) target bundleno = 7 (0x7), region = 83 }
 0x160   :  { %551 = vsyncpa [#allocation3], 1 }
 0x161   :  { %553 = vsyncpa [#allocation3 + $0x1], 1 }
 0x162   :  { %554 = vsyncpa [#allocation6], 1 }
 0x163   :  { %556 = vsyncpa [#allocation6 + $0x1], 1 }
 0x164   :  { %557 = vsyncpa [#allocation4], 1 }
 0x165   :  { %559 = vsyncpa [#allocation4 + $0x1], 1 }

</bundles_post_ra>
